<compile_context>
chip_gen: v7x
topology: tpu7x:2x2x1
jax: 0.10.0
libtpu: 0.0.40
codegen_flags: <defaults>
</compile_context>

<pallas_src>
import functools

import jax
import jax.numpy as jnp
from jax.experimental import pallas as pl
from jax.experimental.pallas import tpu as pltpu

_LANES = 128
_EPS = 1e-07


def _focal_kernel(labels_ref, pred_ref, out_ref, *, gamma, scale, mask_padding):
    j = pl.program_id(1)

    @pl.when(j == 0)
    def _():
        out_ref[...] = jnp.zeros_like(out_ref)

    labels = labels_ref[0]                        # (tile_r, 128) int32
    pred = pred_ref[0]                            # (C=2, tile_r, 128)
    p0 = pred[0].astype(jnp.float32)
    p1 = pred[1].astype(jnp.float32)

    is_c0 = labels == 0
    # Only the true class contributes to -onehot*log(p), so gather p_label
    # with a select instead of looping over classes.
    p_y = jnp.where(is_c0, p0, p1)
    p_y = jnp.clip(p_y, _EPS, 1.0 - _EPS)         # torch.clamp
    fw = 1.0 - p_y                                # focal weight of true class

    gamma_f = float(gamma)
    if gamma_f == float(int(gamma_f)) and int(gamma_f) >= 0:
        # integer gamma: repeated VPU multiplies (co-issue for free, no EUP)
        fw_pow = jnp.ones_like(fw)
        for _ in range(int(gamma_f)):
            fw_pow = fw_pow * fw
    else:
        # non-integer gamma: fall back to exp/log on the EUP (fw >= eps > 0)
        fw_pow = jnp.exp(jnp.float32(gamma_f) * jnp.log(fw))

    contrib = fw_pow * (-jnp.log(p_y))            # single log per pixel
    if float(scale) != 1.0:
        # alpha = [scale, 1.0] along the class dim -> per-pixel select
        contrib = contrib * jnp.where(is_c0, jnp.float32(scale),
                                      jnp.float32(1.0))
    if mask_padding:
        contrib = jnp.where(labels >= 0, contrib, jnp.float32(0.0))

    # Pure element-wise accumulation into the lane-dense output block that
    # stays resident in VMEM across the reduction (j) axis.
    out_ref[0] += contrib


def focal_loss_pallas(y_true, y_pred, *, gamma=2.0, scale=1.0,
                      num_classes=2, tile_rows=1024):
    """y_true: (B, H, W) int labels; y_pred: (B, C, H, W) softmax probs (NCHW)."""
    B, C, H, W = y_pred.shape
    assert C == num_classes == 2, "kernel specialised for the binary case"
    N = H * W
    denom = float(B * H * W * C)

    # Lane-dense layout: flatten spatial dims and split into rows of 128 lanes.
    rows = (N + _LANES - 1) // _LANES
    tile_r = min(int(tile_rows), rows)
    rows_pad = ((rows + tile_r - 1) // tile_r) * tile_r
    n_pad = rows_pad * _LANES
    mask_padding = n_pad != N

    labels = y_true.astype(jnp.int32).reshape(B, N)
    pred = y_pred.reshape(B, C, N)                # free reshape, NO transpose
    if mask_padding:
        labels = jnp.pad(labels, ((0, 0), (0, n_pad - N)), constant_values=-1)
        pred = jnp.pad(pred, ((0, 0), (0, 0), (0, n_pad - N)),
                       constant_values=1.0)
    labels = labels.reshape(B, rows_pad, _LANES)
    pred = pred.reshape(B, C, rows_pad, _LANES)

    kernel = functools.partial(_focal_kernel, gamma=float(gamma),
                               scale=float(scale), mask_padding=mask_padding)

    partial = pl.pallas_call(
        kernel,
        out_shape=jax.ShapeDtypeStruct((B, tile_r, _LANES), jnp.float32),
        grid_spec=pltpu.PrefetchScalarGridSpec(
            num_scalar_prefetch=0,
            grid=(B, rows_pad // tile_r),
            in_specs=[
                pl.BlockSpec((1, tile_r, _LANES), lambda b, j: (b, j, 0)),
                pl.BlockSpec((1, C, tile_r, _LANES), lambda b, j: (b, 0, j, 0)),
            ],
            out_specs=pl.BlockSpec((1, tile_r, _LANES), lambda b, j: (b, 0, 0)),
        ),
        compiler_params=pltpu.CompilerParams(
            dimension_semantics=("parallel", "arbitrary")),
    )(labels, pred)

    # Tiny final reduction + normalization outside the kernel.
    return jnp.sum(partial) / denom


def focal_loss_ref(y_true, y_pred, *, gamma=2.0, scale=1.0, num_classes=2):
    """Pure-JAX mirror of the PyTorch forward (for verification)."""
    y_true_oh = jax.nn.one_hot(y_true, num_classes, dtype=jnp.float32)
    p = jnp.clip(y_pred, 1e-07, 1.0 - 1e-07)
    p = jnp.transpose(p, (0, 2, 3, 1))                   # NCHW -> NHWC
    ce = -y_true_oh * jnp.log(p)
    alpha = jnp.concatenate(
        [jnp.ones_like(p[..., :1]) * scale, jnp.ones_like(p[..., :1])], axis=-1)
    fw = jnp.where(y_true_oh == 1.0, 1.0 - p, p)
    fw = alpha * fw ** gamma
    fl = jnp.sum(fw * ce, axis=(0, 1, 2))
    b, h, w, c = y_true_oh.shape
    return fl.sum() / (b * h * w * c)


if __name__ == "__main__":
    key = jax.random.PRNGKey(0)
    k1, k2 = jax.random.split(key)

    B, C, H, W = 2, 2, 16, 16
    logits = jax.random.normal(k1, (B, C, H, W), dtype=jnp.float32)
    y_pred = jax.nn.softmax(logits, axis=1)              # "already apply softmax"
    y_true = jax.random.randint(k2, (B, H, W), 0, C)

    loss = focal_loss_pallas(y_true, y_pred, gamma=2.0, scale=1.0, num_classes=C)
    loss = jax.block_until_ready(loss)

    ref = focal_loss_ref(y_true, y_pred, gamma=2.0, scale=1.0, num_classes=C)
    assert jnp.allclose(loss, ref, rtol=1e-5, atol=1e-6), (loss, ref)

    print("KERNEL_OK")
</pallas_src>

<mosaic_0001>
module attributes {stable_mosaic.version = 11 : i64} {
  func.func @_focal_kernel(%arg0: i32, %arg1: i32, %arg2: memref<1x2x128xi32, #tpu.memory_space<vmem>>, %arg3: memref<1x2x2x128xf32, #tpu.memory_space<vmem>>, %arg4: memref<1x2x128xf32, #tpu.memory_space<vmem>>) attributes {dimension_semantics = [#tpu.dimension_semantics<parallel>, #tpu.dimension_semantics<arbitrary>], iteration_bounds = array<i64: 2, 1>, scalar_prefetch = 0 : i64, scratch_operands = 0 : i64, tpu.core_type = #tpu.core_type<tc>, window_params = [{transform_indices = @transform_0, window_bounds = array<i64: 1, 2, 128>}, {transform_indices = @transform_1, window_bounds = array<i64: 1, 2, 2, 128>}, {transform_indices = @transform_2, window_bounds = array<i64: 1, 2, 128>}]} {
    %c0_i32 = arith.constant 0 : i32
    %0 = arith.cmpi eq, %arg1, %c0_i32 : i32
    %1 = arith.extui %0 : i1 to i32
    %c0_i32_0 = arith.constant 0 : i32
    %2 = arith.cmpi ne, %1, %c0_i32_0 : i32
    scf.if %2 {
      %cst_18 = arith.constant 0.000000e+00 : f32
      %33 = vector.broadcast %cst_18 : f32 to vector<1x2x128xf32>
      %c0_19 = arith.constant 0 : index
      %c0_20 = arith.constant 0 : index
      %c0_21 = arith.constant 0 : index
      %34 = vector.load %arg4[%c0_19, %c0_20, %c0_21] : memref<1x2x128xf32, #tpu.memory_space<vmem>>, vector<1x2x128xf32>
      tpu.vector_store %arg4[%c0_19, %c0_20, %c0_21], %33 {strides = array<i32>} : memref<1x2x128xf32, #tpu.memory_space<vmem>>, vector<1x2x128xf32>,
    } else {
    }
    %c0 = arith.constant 0 : index
    %c0_1 = arith.constant 0 : index
    %c0_2 = arith.constant 0 : index
    %3 = vector.load %arg2[%c0, %c0_1, %c0_2] : memref<1x2x128xi32, #tpu.memory_space<vmem>>, vector<1x2x128xi32>
    %4 = vector.shape_cast %3 : vector<1x2x128xi32> to vector<2x128xi32>
    %c0_3 = arith.constant 0 : index
    %c0_4 = arith.constant 0 : index
    %c0_5 = arith.constant 0 : index
    %c0_6 = arith.constant 0 : index
    %5 = vector.load %arg3[%c0_3, %c0_4, %c0_5, %c0_6] : memref<1x2x2x128xf32, #tpu.memory_space<vmem>>, vector<1x2x2x128xf32>
    %6 = vector.shape_cast %5 : vector<1x2x2x128xf32> to vector<2x2x128xf32>
    %7 = vector.extract_strided_slice %6 {offsets = [0, 0, 0], sizes = [1, 2, 128], strides = [1, 1, 1]} : vector<2x2x128xf32> to vector<1x2x128xf32>
    %8 = vector.shape_cast %7 : vector<1x2x128xf32> to vector<2x128xf32>
    %9 = vector.extract_strided_slice %6 {offsets = [1, 0, 0], sizes = [1, 2, 128], strides = [1, 1, 1]} : vector<2x2x128xf32> to vector<1x2x128xf32>
    %10 = vector.shape_cast %9 : vector<1x2x128xf32> to vector<2x128xf32>
    %c0_i32_7 = arith.constant 0 : i32
    %11 = vector.broadcast %c0_i32_7 : i32 to vector<2x128xi32>
    %12 = arith.cmpi eq, %4, %11 : vector<2x128xi32>
    %13 = arith.select %12, %8, %10 : vector<2x128xi1>, vector<2x128xf32>
    %cst = arith.constant 1.000000e-07 : f32
    %cst_8 = arith.constant 0.99999988 : f32
    %14 = vector.broadcast %cst : f32 to vector<2x128xf32>
    %15 = arith.maximumf %14, %13 : vector<2x128xf32>
    %16 = vector.broadcast %cst_8 : f32 to vector<2x128xf32>
    %17 = arith.minimumf %16, %15 : vector<2x128xf32>
    %cst_9 = arith.constant 1.000000e+00 : f32
    %18 = vector.broadcast %cst_9 : f32 to vector<2x128xf32>
    %19 = arith.subf %18, %17 : vector<2x128xf32>
    %cst_10 = arith.constant 1.000000e+00 : f32
    %20 = vector.broadcast %cst_10 : f32 to vector<2x128xf32>
    %21 = arith.mulf %20, %19 : vector<2x128xf32>
    %22 = arith.mulf %21, %19 : vector<2x128xf32>
    %23 = math.log %17 : vector<2x128xf32>
    %cst_11 = arith.constant 0.000000e+00 : f32
    %24 = vector.broadcast %cst_11 : f32 to vector<2x128xf32>
    %25 = arith.subf %24, %23 : vector<2x128xf32>
    %26 = arith.mulf %22, %25 : vector<2x128xf32>
    %c0_12 = arith.constant 0 : index
    %c0_13 = arith.constant 0 : index
    %c0_14 = arith.constant 0 : index
    %27 = vector.load %arg4[%c0_12, %c0_13, %c0_14] : memref<1x2x128xf32, #tpu.memory_space<vmem>>, vector<1x2x128xf32>
    %28 = vector.shape_cast %27 : vector<1x2x128xf32> to vector<2x128xf32>
    %29 = arith.addf %28, %26 : vector<2x128xf32>
    %c0_15 = arith.constant 0 : index
    %c0_16 = arith.constant 0 : index
    %c0_17 = arith.constant 0 : index
    %30 = vector.load %arg4[%c0_15, %c0_16, %c0_17] : memref<1x2x128xf32, #tpu.memory_space<vmem>>, vector<1x2x128xf32>
    %31 = vector.shape_cast %30 : vector<1x2x128xf32> to vector<2x128xf32>
    %32 = vector.shape_cast %29 : vector<2x128xf32> to vector<1x2x128xf32>
    tpu.vector_store %arg4[%c0_15, %c0_16, %c0_17], %32 {strides = array<i32>} : memref<1x2x128xf32, #tpu.memory_space<vmem>>, vector<1x2x128xf32>,
    return
  }
  func.func @transform_0(%arg0: i32, %arg1: i32) -> (i32, i32, i32) {
    %c0_i32 = arith.constant 0 : i32
    %c0_i32_0 = arith.constant 0 : i32
    return %arg0, %arg1, %c0_i32 : i32, i32, i32
  }
  func.func @transform_1(%arg0: i32, %arg1: i32) -> (i32, i32, i32, i32) {
    %c0_i32 = arith.constant 0 : i32
    %c0_i32_0 = arith.constant 0 : i32
    %c0_i32_1 = arith.constant 0 : i32
    return %arg0, %c0_i32, %arg1, %c0_i32_0 : i32, i32, i32, i32
  }
  func.func @transform_2(%arg0: i32, %arg1: i32) -> (i32, i32, i32) {
    %c0_i32 = arith.constant 0 : i32
    %c0_i32_0 = arith.constant 0 : i32
    %c0_i32_1 = arith.constant 0 : i32
    return %arg0, %c0_i32, %c0_i32_0 : i32, i32, i32
  }
}

</mosaic_0001>

<bundles_post_ra>
// kernel: tpu_custom_call.1
= control target key start
LH: loop header
LB: loop body
LE: loop exit
PB: predicated region body
PF: predicated region fallthrough
CT: control target
= control target key end

     0   :  { %7 = vsyncpa [#allocation3], 0  ;;  %s838_s0 = inlined_call_operand.hbm [shape: s32[2,2,128], index: 0, kind: input, shape index: {}]   ;;  %s839_s1 = inlined_call_operand.hbm [shape: f32[2,2,2,128], index: 1, kind: input, shape index: {}]   ;;  %s840_s2 = inlined_call_operand.hbm [shape: f32[2,2,128], index: 2, kind: output, shape index: {}]  }
   0x1   :  { %9 = vsyncpa [#allocation3 + $0x1], 0 }
   0x2   :  { %10 = vsyncpa [#allocation6], 0 }
   0x3   :  { %12 = vsyncpa [#allocation6 + $0x1], 0 }
   0x4   :  { %13 = vsyncpa [#allocation4], 0 }
   0x5   :  { %15 = vsyncpa [#allocation4 + $0x1], 0  ;;  %s615_s9 = smov 0   ;;  %s617_s10 = smov 0  }
   0x6   :  { %s619_s11 = smov 0   ;;  %s621_s12 = smov 0  }
   0x7   :  { %s623_s13 = smov 0   ;;  %s625_s14 = smov 0  }
   0x8 LB: > { %s356_s15 = sadd.s32 4294967295, %s592_s14   ;;  %s357_s16 = sadd.s32 4294967294, %s592_s14   ;;  %s592_s14 = sphi %s625_s14, %s21_s14   ;;  %s588_s13 = sphi %s623_s13, %s859_s13   ;;  %s584_s12 = sphi %s621_s12, %s858_s12   ;;  %s580_s11 = sphi %s619_s11, %s857_s11   ;;  %s576_s10 = sphi %s617_s10, %s856_s10   ;;  %s572_s9 = sphi %s615_s9, %s855_s9  }
   0x9   : > { %s33_s17 = sadd.s32 1, %s588_s13  ;;  %s42_s18 = sadd.s32 1, %s580_s11 }
   0xa   : > { %p35_p0 = scmp.ge.s32.totalorder %s33_s17, 2  ;;  %p49_p1 = scmp.ne.s32.totalorder %s580_s11, %s576_s10 }
   0xb   : > { %p50_p2 = scmp.eq.s32.totalorder %s592_s14, 0  ;;  %p55_p3 = scmp.ne.s32.totalorder %s576_s10, %s572_s9 }
   0xc   : > { %s861_s17 = smov (%p35_p0, %s33_s17), 0  ;;  %p56_p5 = scmp.eq.s32.totalorder %s356_s15, 0 }
   0xd   : > { %p656_p4 = por %p50_p2, %p49_p1  ;;  %s37_s20 = ssub.s32 %s588_s13, %s861_s17 }
   0xe   : > { %p107_p6 = scmp.eq.s32.totalorder %s356_s15, 1  ;;  %p40_p7 = scmp.eq.s32.totalorder %s37_s20, 0 }
   0xf   : > { %p662_p8 = por %p56_p5, %p55_p3  ;;  %p113_p10 = scmp.eq.s32.totalorder %s357_s16, 1 }
  0x10   : > { %p666_p9 = por %p107_p6, %p49_p1  ;;  %p391_p13 = scmp.lt.s32.totalorder %s592_s14, 2 }
  0x11   : > { %s844_s21 = scalar_select %p662_p8, 1, 0 }
  0x12   : > { %s845_s22 = scalar_select %p666_p9, 1, 0 }
  0x13   : > { %s671_s23 = scalar_select %p40_p7, %s580_s11, %s42_s18  }
  0x14   : > { %p673_p11 = por %p113_p10, %p55_p3  ;;  %s680_s25 = sand.u32 1, %s580_s11  }
  0x15   : > { %s360_s26 = sshll.u32 %s680_s25, 1  ;;  %s361_s27 = sshll.u32 %s588_s13, 5 }
  0x16   : > { %s846_s24 = scalar_select %p673_p11, 1, 0 }
  0x17   : > { %s687_s30 = scalar_lea.hbm %s838_s0, %s361_s27  ;;  %s137_s3 = scalar_lea.vmem [#allocation2], %s360_s26 }
  0x18   : > { %s145_s4 = sshll.u32 %s137_s3, 4  ;;  %p693_p0 = pnand %p391_p13, %p656_p4  ;;  %s689_s4 = int_to_ptr.vmem [resolvable:$true] %s145_s4 }
  0x19   : > { %s134_s6 = scalar_lea.sflag [#allocation3], %s680_s25  ;;  %s446_s7 = scalar_lea.hbm %s687_s30, 32 }
  0x1a   : > { %p447_p3 = scmp.ne.s32.totalorder %s687_s30, %s446_s7  ;;  %p448_p5 = pneg %p693_p0 }
  0x1b   : > { %s451_s16 = scalar_lea.hbm %s838_s0, 64  ;;  %p452_p4 = scmp.lt.u32.totalorder %s687_s30, %s838_s0 }
  0x1c   : > { %p449_p6 = pnand %p448_p5, %p447_p3  ;;  %p453_p10 = scmp.lt.u32.totalorder %s451_s16, %s446_s7 }
  0x1d   : > { %p455_p12 = scmp.lt.u32.totalorder %s446_s7, %s687_s30 }
  0x1e   : > { %p450_p7 = pneg %p449_p6  ;;  %p454_p13 = por %p453_p10, %p452_p4 }
  0x20   : > { %p456_p1 = por %p455_p12, %p454_p13 }
  0x22   : > { %p457_p2 = pnand %p456_p1, %p450_p7 }
  0x24   : > { %460 = shalt.err (!%p457_p2)
}
  0x25   : > { %s461_s20 = scalar_lea.vmem %s689_s4, 32  ;;  %s594_s26 = smov [#allocation2]  }
  0x26   : > { %p462_p3 = scmp.ne.s32.totalorder %s689_s4, %s461_s20  ;;  %s466_s27 = sshll.u32 %s594_s26, 4  ;;  %s467_s27 = int_to_ptr.vmem [resolvable:$false] %s466_s27 }
  0x27   : > { %s468_s28 = scalar_lea.vmem %s467_s27, 64  ;;  %p469_p9 = scmp.lt.s32.totalorder %s689_s4, %s467_s27 }
  0x28   : > { %p464_p6 = pnand %p462_p3, %p448_p5  ;;  %p470_p4 = scmp.lt.s32.totalorder %s468_s28, %s461_s20 }
  0x2a   : > { %p465_p11 = pneg %p464_p6  ;;  %p471_p10 = por %p470_p4, %p469_p9 }
  0x2c   : > { %p472_p12 = pnand %p471_p10, %p465_p11 }
  0x2e   : > { %475 = shalt.err (!%p472_p12)
}
  0x2f   : > { %383 = dma.hbm_to_vmem [thread:$0]  (!%p693_p0), %s687_s30, 32, %s689_s4, %s134_s6  }
  0x30   : > { %p848_p1 = scmp.lt.s32.totalorder %s592_s14, 3  ;;  %p849_p2 = scmp.ge.s32.totalorder %s592_s14, 1 }
  0x31   : > { %s362_s3 = sshll.u32 %s680_s25, 2  ;;  %s373_s7 = sshll.u32 %s588_s13, 6 }
  0x32   : > { %p729_p7 = pnand %p849_p2, %p848_p1  ;;  %s738_s16 = scalar_lea.hbm %s839_s1, %s373_s7 }
  0x33   : > { %s156_s18 = scalar_lea.vmem [#allocation5], %s362_s3  ;;  %s153_s30 = scalar_lea.sflag [#allocation6], %s680_s25 }
  0x34   : > { %s164_s19 = sshll.u32 %s156_s18, 4  ;;  %s476_s4 = scalar_lea.hbm %s738_s16, 64  ;;  %s740_s19 = int_to_ptr.vmem [resolvable:$true] %s164_s19 }
  0x35   : > { %p477_p9 = scmp.ne.s32.totalorder %s738_s16, %s476_s4  ;;  %s481_s26 = scalar_lea.hbm %s839_s1, 128 }
  0x36   : > { %p482_p3 = scmp.lt.u32.totalorder %s738_s16, %s839_s1  ;;  %p483_p6 = scmp.lt.u32.totalorder %s481_s26, %s476_s4 }
  0x37   : > { %p479_p11 = pnand %p477_p9, %p448_p5  ;;  %p485_p10 = scmp.lt.u32.totalorder %s476_s4, %s738_s16 }
  0x38   : > { %p484_p4 = por %p483_p6, %p482_p3 }
  0x39   : > { %p480_p13 = pneg %p479_p11 }
  0x3a   : > { %p486_p12 = por %p485_p10, %p484_p4 }
  0x3c   : > { %p487_p1 = pnand %p486_p12, %p480_p13 }
  0x3e   : > { %490 = shalt.err (!%p487_p1)
}
  0x3f   : > { %s491_s3 = scalar_lea.vmem %s740_s19, 64  ;;  %s595_s7 = smov [#allocation5]  }
  0x40   : > { %p492_p2 = scmp.ne.s32.totalorder %s740_s19, %s491_s3  ;;  %s496_s8 = sshll.u32 %s595_s7, 4  ;;  %s497_s8 = int_to_ptr.vmem [resolvable:$false] %s496_s8 }
  0x41   : > { %s498_s15 = scalar_lea.vmem %s497_s8, 128  ;;  %p499_p8 = scmp.lt.s32.totalorder %s740_s19, %s497_s8 }
  0x42   : > { %p494_p9 = pnand %p492_p2, %p448_p5  ;;  %p500_p3 = scmp.lt.s32.totalorder %s498_s15, %s491_s3 }
  0x44   : > { %p495_p11 = pneg %p494_p9  ;;  %p501_p6 = por %p500_p3, %p499_p8 }
  0x46   : > { %p502_p4 = pnand %p501_p6, %p495_p11 }
  0x48   : > { %505 = shalt.err (!%p502_p4)
}
  0x49   : > { %s596_s18 = smov 32   ;;  %s597_s4 = smov 2  }
  0x4a   : > { %386 = dma.hbm_to_vmem [thread:$0]  (!%p693_p0), %s738_s16, 64, %s740_s19, %s153_s30, %s596_s18, %s596_s18, %s597_s4  }
  0x4b   : > { %176 = sbr.rel (%p729_p7) target bundleno = 126 (0x7e), region = 28  ;;  %s771_s6 = sand.u32 (!%p729_p7), 1, %s576_s10  }
  0x4c   : > { %s366_s20 = sshll.u32 (!%p729_p7), %s771_s6, 1  ;;  %s179_s26 = scalar_lea.sflag (!%p729_p7), [#allocation3], %s771_s6 }
  0x4d   : > { %s182_s27 = scalar_lea.vmem (!%p729_p7), [#allocation2], %s366_s20  ;;  %p851_p8 = scmp.ne.s32.totalorder (!%p729_p7), %s844_s21, 0 }
  0x52   : > { %559 = dma.done.wait (%p851_p8), %s179_s26, 32  }
  0x53   : > { %561 = vsyncadd (%p851_p8), %s179_s26, 4294967264  ;;  %s367_s25 = sshll.u32 %s771_s6, 2  ;;  %s188_s5 = scalar_lea.sflag [#allocation6], %s771_s6 }
  0x54   : > { %s191_s29 = scalar_lea.vmem [#allocation5], %s367_s25 }
  0x55   : > { %563 = dma.done.wait (%p851_p8), %s188_s5, 64  }
  0x56   : > { %565 = vsyncadd (%p851_p8), %s188_s5, 4294967232  ;;  %s216_s16 = scalar_lea.vmem [#allocation7], %s366_s20  ;;  %v598_v0 = vmov 0.0   ;;  %v222_v1 = vld [vmem:[%s182_s27] sm:$0x3]  ;;  %s370_s21 = sshll.u32 %s584_s12, 5 }
  0x57   : > { %221 = vst [vmem:[%s216_s16] sm:$0x3] %v598_v0  ;;  %v223_v2 = vld [vmem:[%s191_s29] sm:$0x3]  ;;  %v224_v3 = vld [vmem:[%s191_s29 + $0x2] sm:$0x3]  ;;  %vm225_vm0 = vcmp.eq.s32.totalorder %v222_v1, 0  ;;  %s789_s3 = scalar_lea.hbm %s840_s2, %s370_s21 }
  0x58   : > { %v226_v4 = vsel %vm225_vm0, %v223_v2, %v224_v3  ;;  %s252_s19 = sshll.u32 %s216_s16, 4  ;;  %s239_s7 = scalar_lea.sflag [#allocation4], %s771_s6  ;;  %s791_s19 = int_to_ptr.vmem [resolvable:$true] %s252_s19 }
  0x59   : > { %v227_v5 = vmax.f32 %v226_v4, 1e-07  ;;  %s506_s8 = scalar_lea.vmem %s791_s19, 32  ;;  %p852_p5 = scmp.ne.s32.totalorder %s845_s22, 0 }
  0x5a   : > { %p507_p0 = scmp.ne.s32.totalorder %s791_s19, %s506_s8  ;;  %s599_s12 = smov [#allocation7]  }
  0x5b   : > { %v228_v6 = vmin.f32 %v227_v5, 0.9999999  ;;  %s510_s15 = sshll.u32 %s599_s12, 4  ;;  %s511_s15 = int_to_ptr.vmem [resolvable:$false] %s510_s15 }
  0x5c   : > { %p508_p7 = pnand %p507_p0, %p852_p5  ;;  %s512_s18 = scalar_lea.vmem %s511_s15, 64 }
  0x5d   : > { %444 = vlog2.f32 %v228_v6  ;;  %v229_v7 = vsub.f32 1.0, %v228_v6  ;;  %p513_p10 = scmp.lt.s32.totalorder %s791_s19, %s511_s15  ;;  %p514_p12 = scmp.lt.s32.totalorder %s512_s18, %s506_s8 }
  0x5e   : > { %v235_v12 = vld [vmem:[%s216_s16] sm:$0x3]  ;;  %p509_p13 = pneg %p508_p7 }
  0x5f   : > { %v230_v9 = vmul.f32 %v229_v7, %v229_v7  ;;  %p515_p1 = por %p514_p12, %p513_p10 }
  0x61   : > { %p516_p2 = pnand %p515_p1, %p509_p13 }
  0x67   : > { %v445_v8 = vpop.eup %444 }
  0x68   : > { %v232_v10 = vmul.f32 0.6931472, %v445_v8 }
  0x6a   : > { %v233_v11 = vsub.f32 0.0, %v232_v10 }
  0x6c   : > { %v234_v13 = vmul.f32 %v233_v11, %v230_v9 }
  0x6e   : > { %v236_v14 = vadd.f32 %v235_v12, %v234_v13 }
  0x70   : > { %237 = vst [vmem:[%s216_s16] sm:$0x3] %v236_v14 }
  0x71   : > { %519 = shalt.err (!%p516_p2)
}
  0x72   : > { %s520_s4 = scalar_lea.hbm %s789_s3, 32  ;;  %s524_s26 = scalar_lea.hbm %s840_s2, 64 }
  0x73   : > { %p521_p9 = scmp.ne.s32.totalorder %s789_s3, %s520_s4  ;;  %p525_p6 = scmp.lt.u32.totalorder %s789_s3, %s840_s2 }
  0x74   : > { %p526_p4 = scmp.lt.u32.totalorder %s524_s26, %s520_s4  ;;  %p528_p0 = scmp.lt.u32.totalorder %s520_s4, %s789_s3 }
  0x75   : > { %p522_p11 = pnand %p521_p9, %p852_p5 }
  0x76   : > { %p527_p8 = por %p526_p4, %p525_p6 }
  0x77   : > { %p523_p3 = pneg %p522_p11 }
  0x78   : > { %p529_p7 = por %p528_p0, %p527_p8 }
  0x7a   : > { %p530_p13 = pnand %p529_p7, %p523_p3 }
  0x7c   : > { %533 = shalt.err (!%p530_p13)
}
  0x7d   : > { %378 = dma.vmem_to_hbm [thread:$0]  (%p852_p5), %s791_s19, 32, %s789_s3, %s239_s7  }
  0x7e PF: > { %s264_s5 = sand.u32 1, %s572_s9   ;;  %p853_p10 = scmp.ne.s32.totalorder %s846_s24, 0 }
  0x7f   : > { %p854_p12 = scmp.ge.s32.totalorder %s592_s14, 2  ;;  %s265_s29 = scalar_lea.sflag [#allocation4], %s264_s5 }
  0x81   : > { %p388_p1 = pnand %p854_p12, %p853_p10 }
  0x83   : > { %567 = dma.done.wait (!%p388_p1), %s265_s29, 32  }
  0x84   : > { %569 = vsyncadd (!%p388_p1), %s265_s29, 4294967264  ;;  %s21_s14 = sadd.s32 1, %s592_s14   ;;  %s855_s9 = smov %s576_s10 }
  0x85   : > { %p18_p2 = scmp.ge.s32.totalorder %s21_s14, 4   ;;  %s856_s10 = smov %s580_s11 }
  0x86   : > { %s857_s11 = smov %s671_s23  ;;  %s858_s12 = smov %s588_s13 }
  0x87   : > { %s859_s13 = smov %s861_s17  ;;  %20 = sbr.rel (!%p18_p2) target bundleno = 8 (0x8), region = 90 }
  0x8e   :  { %270 = vsyncpa [#allocation3], 1 }
  0x8f   :  { %272 = vsyncpa [#allocation3 + $0x1], 1 }
  0x90   :  { %273 = vsyncpa [#allocation6], 1 }
  0x91   :  { %275 = vsyncpa [#allocation6 + $0x1], 1 }
  0x92   :  { %276 = vsyncpa [#allocation4], 1 }
  0x93   :  { %278 = vsyncpa [#allocation4 + $0x1], 1 }

</bundles_post_ra>
